<compile_context>
chip_gen: v5e
topology: v5e:2x2
jax: 0.10.0
libtpu: 0.0.40
codegen_flags: <defaults>
</compile_context>

<pallas_src>
import jax
import jax.numpy as jnp
from jax.experimental import pallas as pl
from jax.experimental.pallas import tpu as pltpu


def _interp_matrix(in_size: int, scale: int) -> jnp.ndarray:
    """(in_size*scale, in_size) linear-interp matrix matching PyTorch
    F.interpolate(..., mode='trilinear', align_corners=False) on one axis."""
    out_size = in_size * scale
    out_idx = jnp.arange(out_size, dtype=jnp.float32)
    coord = (out_idx + 0.5) / float(scale) - 0.5
    coord = jnp.maximum(coord, 0.0)                      # PyTorch clamps negatives to 0
    low = jnp.floor(coord).astype(jnp.int32)
    frac = coord - low.astype(jnp.float32)
    low = jnp.minimum(low, in_size - 1)
    high = jnp.minimum(low + 1, in_size - 1)
    rows = jnp.arange(out_size)
    A = jnp.zeros((out_size, in_size), dtype=jnp.float32)
    A = A.at[rows, low].add(1.0 - frac)
    A = A.at[rows, high].add(frac)
    return A                                             # (out, in)


# ----------------------------------------------------------------------------
# Kernels
# ----------------------------------------------------------------------------

def _kron_upsample_kernel(x_ref, m_ref, o_ref):
    # Single MXU matmul, no relayouts: (tb, H*W) @ (H*W, 4*H*W) -> (tb, 4*H*W).
    o_ref[...] = jnp.dot(
        x_ref[...], m_ref[...], preferred_element_type=jnp.float32
    ).astype(o_ref.dtype)


def _separable_upsample_kernel(x_ref, ah_t_ref, aw_t_ref, o_ref):
    # Fallback for large planes: height pass first (minor dim still W), then
    # width pass; result lands in (tb, 2H, 2W) order with no final transpose.
    tb = x_ref.shape[0]
    H = ah_t_ref.shape[0]                                # ah_t: (H, 2H)
    W = aw_t_ref.shape[0]                                # aw_t: (W, 2W)
    H2, W2 = 2 * H, 2 * W

    x = x_ref[...].astype(jnp.float32).reshape(tb, H, W)
    xt = jnp.transpose(x, (0, 2, 1)).reshape(tb * W, H)               # (tb*W, H)
    t = jnp.dot(xt, ah_t_ref[...], preferred_element_type=jnp.float32)  # (tb*W, 2H)
    tt = jnp.transpose(t.reshape(tb, W, H2), (0, 2, 1)).reshape(tb * H2, W)
    y = jnp.dot(tt, aw_t_ref[...], preferred_element_type=jnp.float32)  # (tb*2H, 2W)
    o_ref[...] = y.reshape(tb, H2 * W2).astype(o_ref.dtype)


# ----------------------------------------------------------------------------
# VMEM budgeting & grid shaping
# ----------------------------------------------------------------------------

def _scoped_vmem_bytes() -> int:
    try:
        cap = int(pltpu.get_tpu_info().vmem_capacity_bytes)
    except Exception:
        cap = 64 * 1024 * 1024          # conservative fallback (v7x physical VMEM)
    # ~0.625x of physical, capped at 64 MiB: 64 MiB on v5e/v6e, 40 MiB on v7x.
    return min((cap * 5) // 8, 64 * 1024 * 1024)


def _choose_tb(B: int, per_slice_bytes: int, budget_bytes: int) -> int:
    if B <= 8:
        return int(B)                   # single full-extent block
    tb_cap = (max(budget_bytes, per_slice_bytes) // per_slice_bytes) // 8 * 8
    tb_cap = max(8, min(tb_cap, 1024))
    # Megacore / pipelining: target >= 8 near-equal, multiple-of-8 grid steps
    # when B allows; deeper grids beat max-tb (per-step overhead ~0.35 us).
    target_steps = min(8, -(-B // 8))
    per_step = -(-B // target_steps)
    tb_target = -(-per_step // 8) * 8
    return int(max(8, min(tb_cap, tb_target)))


# ----------------------------------------------------------------------------
# Wrapper
# ----------------------------------------------------------------------------

def upsample_mod(x: jnp.ndarray) -> jnp.ndarray:
    """x: (N, C, D, H, W) float32 -> (N, C, D, 2H, 2W), trilinear, scale (1,2,2)."""
    N, C, D, H, W = x.shape
    B = N * C * D
    H2, W2 = 2 * H, 2 * W
    HW, HW4 = H * W, H2 * W2

    elt = jnp.dtype(x.dtype).itemsize
    scoped = _scoped_vmem_bytes()
    budget = (scoped * 7) // 10         # single haircut for headroom

    x_flat = x.reshape(B, HW)           # lane-dense HBM-facing slab
    out_shape = jax.ShapeDtypeStruct((B, HW4), x.dtype)
    compiler_params = pltpu.CompilerParams(
        dimension_semantics=("parallel",),
        vmem_limit_bytes=scoped,
    )

    a_h = _interp_matrix(H, 2)          # (2H, H)
    a_w = _interp_matrix(W, 2)          # (2W, W)

    m_bytes = HW * HW4 * 4
    use_kron = (HW <= 1024) and (m_bytes <= budget // 2)

    if use_kron:
        # M[h*W + w, i*W2 + j] = a_h[i, h] * a_w[j, w]  -> y_flat = x_flat @ M
        m = (a_h[:, None, :, None] * a_w[None, :, None, :]).reshape(HW4, HW).T

        # Per-slice VMEM: 2x-buffered input + 2x-buffered output + f32 matmul result.
        per_slice = (2 * HW + 2 * HW4) * elt + HW4 * 4
        tb = _choose_tb(B, per_slice, budget - m_bytes)
        grid = (pl.cdiv(B, tb),)        # ragged last block handled by Pallas

        out_flat = pl.pallas_call(
            _kron_upsample_kernel,
            out_shape=out_shape,
            grid_spec=pltpu.PrefetchScalarGridSpec(
                num_scalar_prefetch=0,
                grid=grid,
                in_specs=[
                    pl.BlockSpec((tb, HW), lambda i: (i, 0)),
                    pl.BlockSpec((HW, HW4), lambda i: (0, 0)),   # resident constant
                ],
                out_specs=pl.BlockSpec((tb, HW4), lambda i: (i, 0)),
            ),
            compiler_params=compiler_params,
        )(x_flat, m)
    else:
        ah_t = a_h.T                    # (H, 2H)
        aw_t = a_w.T                    # (W, 2W)
        # Per-slice VMEM, including 128-lane padding of the narrow intermediates
        # (xt minor dim H, t minor dim 2H, tt minor dim W, y minor dim 2W).
        lane = 128
        pad_rows = W + 2 * W + H2 + H2                   # rows of each padded temp
        per_slice = (2 * HW + 2 * HW4) * elt + pad_rows * max(lane, 1) * 4
        const_bytes = (H * H2 + W * W2) * 4
        tb = _choose_tb(B, per_slice, budget - const_bytes)
        grid = (pl.cdiv(B, tb),)

        out_flat = pl.pallas_call(
            _separable_upsample_kernel,
            out_shape=out_shape,
            grid_spec=pltpu.PrefetchScalarGridSpec(
                num_scalar_prefetch=0,
                grid=grid,
                in_specs=[
                    pl.BlockSpec((tb, HW), lambda i: (i, 0)),
                    pl.BlockSpec((H, H2), lambda i: (0, 0)),     # resident constant
                    pl.BlockSpec((W, W2), lambda i: (0, 0)),     # resident constant
                ],
                out_specs=pl.BlockSpec((tb, HW4), lambda i: (i, 0)),
            ),
            compiler_params=compiler_params,
        )(x_flat, ah_t, aw_t)

    return out_flat.reshape(N, C, D, H2, W2)


if __name__ == "__main__":
    key = jax.random.PRNGKey(0)
    N, C, D, H, W = 2, 4, 3, 16, 16
    x = jax.random.normal(key, (N, C, D, H, W), dtype=jnp.float32)

    out = upsample_mod(x)
    out = jax.block_until_ready(out)
    assert out.shape == (N, C, D, 2 * H, 2 * W), out.shape

    # Cross-check against jax.image.resize (half-pixel-center linear resize;
    # identical to PyTorch align_corners=False for the exact-2x case).
    ref = jax.image.resize(x, (N, C, D, 2 * H, 2 * W), method="trilinear")
    assert jnp.allclose(out, ref, atol=1e-5, rtol=1e-5), float(
        jnp.max(jnp.abs(out - ref)))

    print("KERNEL_OK")
</pallas_src>

<mosaic_0001>
module attributes {stable_mosaic.version = 11 : i64} {
  func.func @_kron_upsample_kernel(%arg0: i32, %arg1: memref<8x256xf32, #tpu.memory_space<vmem>>, %arg2: memref<256x1024xf32, #tpu.memory_space<vmem>>, %arg3: memref<8x1024xf32, #tpu.memory_space<vmem>>) attributes {dimension_semantics = [#tpu.dimension_semantics<parallel>], iteration_bounds = array<i64: 3>, scalar_prefetch = 0 : i64, scratch_operands = 0 : i64, tpu.core_type = #tpu.core_type<tc>, window_params = [{transform_indices = @transform_0, window_bounds = array<i64: 8, 256>}, {pipeline_mode = #tpu.pipeline_mode<synchronous>, transform_indices = @transform_1, window_bounds = array<i64: 256, 1024>}, {transform_indices = @transform_2, window_bounds = array<i64: 8, 1024>}]} {
    %c0 = arith.constant 0 : index
    %c0_0 = arith.constant 0 : index
    %0 = vector.load %arg1[%c0, %c0_0] : memref<8x256xf32, #tpu.memory_space<vmem>>, vector<8x256xf32>
    %c0_1 = arith.constant 0 : index
    %c0_2 = arith.constant 0 : index
    %1 = vector.load %arg2[%c0_1, %c0_2] : memref<256x1024xf32, #tpu.memory_space<vmem>>, vector<256x1024xf32>
    %cst = arith.constant dense<0.000000e+00> : vector<8x1024xf32>
    %2 = tpu.matmul %0, %1, %cst {dimension_numbers = #tpu.dot_dimension_numbers<[1], [0], [0], [1], [0, 0, 1, 1], [], []>} : vector<8x256xf32>, vector<256x1024xf32>, vector<8x1024xf32> -> vector<8x1024xf32>
    %c0_3 = arith.constant 0 : index
    %c0_4 = arith.constant 0 : index
    %3 = vector.load %arg3[%c0_3, %c0_4] : memref<8x1024xf32, #tpu.memory_space<vmem>>, vector<8x1024xf32>
    tpu.vector_store %arg3[%c0_3, %c0_4], %2 {strides = array<i32>} : memref<8x1024xf32, #tpu.memory_space<vmem>>, vector<8x1024xf32>,
    return
  }
  func.func @transform_0(%arg0: i32) -> (i32, i32) {
    %c0_i32 = arith.constant 0 : i32
    %c0_i32_0 = arith.constant 0 : i32
    return %arg0, %c0_i32 : i32, i32
  }
  func.func @transform_1(%arg0: i32) -> (i32, i32) {
    %c0_i32 = arith.constant 0 : i32
    %c0_i32_0 = arith.constant 0 : i32
    %c0_i32_1 = arith.constant 0 : i32
    return %c0_i32, %c0_i32_0 : i32, i32
  }
  func.func @transform_2(%arg0: i32) -> (i32, i32) {
    %c0_i32 = arith.constant 0 : i32
    %c0_i32_0 = arith.constant 0 : i32
    return %arg0, %c0_i32 : i32, i32
  }
}

</mosaic_0001>

<bundles_post_ra>
// kernel: tpu_custom_call.1
= control target key start
LH: loop header
LB: loop body
LE: loop exit
PB: predicated region body
PF: predicated region fallthrough
CT: control target
= control target key end

     0   :  { %7 = vsyncpa [#allocation3], 0  ;;  %s1259_s0 = inlined_call_operand.hbm [shape: f32[24,256], index: 0, kind: input, shape index: {}]   ;;  %s1260_s1 = inlined_call_operand.hbm [shape: f32[256,1024], index: 1, kind: input, shape index: {}]   ;;  %s1261_s2 = inlined_call_operand.hbm [shape: f32[24,1024], index: 2, kind: output, shape index: {}]  }
   0x1   :  { %9 = vsyncpa [#allocation3 + $0x1], 0 }
   0x2   :  { %10 = vsyncpa [#allocation6], 0 }
   0x3   :  { %11 = vsyncpa [#allocation4], 0 }
   0x4   :  { %13 = vsyncpa [#allocation4 + $0x1], 0  ;;  %s1089_s9 = smov 0   ;;  %s1091_s10 = smov 0  }
   0x5   :  { %s1093_s11 = smov 0   ;;  %s1095_s12 = smov 0  }
   0x6 LB: > { %s108_s15 = sshll.u32 %s1260_s1, 4  ;;  %s1113_s16 = sadd.s32 4294967295, %s1069_s12   ;;  %s1069_s12 = sphi %s1095_s12, %s1270_s12   ;;  %s1065_s11 = sphi %s1093_s11, %s1269_s11   ;;  %s1061_s10 = sphi %s1091_s10, %s1268_s10   ;;  %s1057_s9 = sphi %s1089_s9, %s1267_s9   ;;  %s109_s15 = int_to_ptr.hbm [resolvable:$true] %s108_s15 }
   0x7   : > { %p863_p0 = scmp.ge.s32.totalorder %s1069_s12, 1  ;;  %p40_p1 = scmp.eq.s32.totalorder %s1113_s16, 0 }
   0x8   : > { %p97_p2 = scmp.lt.s32.totalorder %s1069_s12, 4  ;;  %s1071_s18 = smov [#allocation5]  }
   0x9   : > { %s110_s19 = sshll.u32 %s1071_s18, 4  ;;  %s1072_s20 = smov 1024   ;;  %s111_s19 = int_to_ptr.vmem [resolvable:$true] %s110_s19 }
   0xa   : > { %p1118_p3 = pnand %p863_p0, %p97_p2  ;;  %s1073_s21 = smov 64  }
   0xb   : > { %s862_s22 = sadd.s32 4294967294, %s1069_s12   ;;  %s1128_s23 = sadd.s32 1, %s1069_s12  }
   0xc   : > { %p888_p4 = pneg %p1118_p3  ;;  %s26_s24 = sadd.s32 1, %s1065_s11 }
   0xd   : > { %s23_s25 = ssub.s32 %s1069_s12, %s1128_s23  ;;  %p33_p6 = scmp.ne.s32.totalorder %s1065_s11, %s1061_s10 }
   0xe   : > { %p889_p5 = pnand %p888_p4, %p40_p1  ;;  %p24_p7 = scmp.eq.s32.totalorder %s23_s25, 0 }
   0xf   : > { %p34_p8 = scmp.eq.s32.totalorder %s1069_s12, 0  ;;  %p39_p9 = scmp.ne.s32.totalorder %s1061_s10, %s1057_s9 }
  0x10   : > { %891 = dma.hbm_to_vmem [thread:$0]  (!%p889_p5), %s109_s15, 32768, %s111_s19, [#allocation6], %s1072_s20, %s1072_s20, %s1073_s21  }
  0x11   : > { %p84_p10 = scmp.eq.s32.totalorder %s1113_s16, 2  ;;  %p1144_p11 = por %p40_p1, %p39_p9 }
  0x12   : > { %s1140_s26 = scalar_select %p24_p7, %s1065_s11, %s26_s24  }
  0x13   : > { %p1148_p12 = por %p84_p10, %p33_p6  ;;  %p90_p13 = scmp.eq.s32.totalorder %s862_s22, 2 }
  0x14   : > { %p35_p0 = por %p34_p8, %p33_p6  ;;  %s124_s29 = sand.u32 1, %s1065_s11  }
  0x15   : > { %p1153_p2 = por %p90_p13, %p39_p9  ;;  %p901_p4 = scmp.lt.s32.totalorder %s1069_s12, 3 }
  0x16   : > { %s866_s3 = sshll.u32 %s124_s29, 4  ;;  %s878_s4 = sshll.u32 %s1069_s12, 4 }
  0x17   : > { %s133_s7 = scalar_lea.hbm %s1259_s0, %s878_s4  ;;  %s128_s13 = scalar_lea.vmem [#allocation2], %s866_s3 }
  0x18   : > { %s135_s8 = sshll.u32 %s133_s7, 4  ;;  %s137_s14 = sshll.u32 %s128_s13, 4  ;;  %s136_s8 = int_to_ptr.hbm [resolvable:$true] %s135_s8  ;;  %s138_s14 = int_to_ptr.vmem [resolvable:$true] %s137_s14 }
  0x19   : > { %p1162_p5 = pnand %p901_p4, %p35_p0  ;;  %s125_s18 = scalar_lea.sflag [#allocation3], %s124_s29 }
  0x1a   : > { %s969_s19 = sshra.s32 %s136_s8, 4  ;;  %s976_s24 = scalar_lea.hbm %s1259_s0, 48  ;;  %s970_s19 = int_to_ptr.hbm [resolvable:$true] %s969_s19 }
  0x1b   : > { %s971_s20 = scalar_lea.hbm %s970_s19, 16  ;;  %p973_p7 = pneg %p1162_p5 }
  0x1c   : > { %p972_p6 = scmp.ne.s32.totalorder %s970_s19, %s971_s20  ;;  %p977_p10 = scmp.lt.s32.totalorder %s970_s19, %s1259_s0 }
  0x1d   : > { %p978_p13 = scmp.lt.s32.totalorder %s976_s24, %s971_s20 }
  0x1e   : > { %p974_p8 = pnand %p973_p7, %p972_p6 }
  0x1f   : > { %p979_p0 = por %p978_p13, %p977_p10 }
  0x20   : > { %p975_p9 = pneg %p974_p8 }
  0x22   : > { %p980_p4 = pnand %p979_p0, %p975_p9 }
  0x24   : > { %983 = shalt.err (!%p980_p4)
}
  0x25   : > { %895 = dma.hbm_to_vmem [thread:$0]  (!%p1162_p5), %s136_s8, 256, %s138_s14, %s125_s18  }
  0x26   : > { %146 = sbr.rel (%p1118_p3) target bundleno = 316 (0x13c), region = 28  ;;  %s1179_s29 = sand.u32 (!%p1118_p3), 1, %s1061_s10  }
  0x27   : > { %s870_s4 = sshll.u32 (!%p1118_p3), %s1179_s29, 4  ;;  %s149_s5 = scalar_lea.sflag (!%p1118_p3), [#allocation3], %s1179_s29 }
  0x28   : > { %s1183_s6 = scalar_lea.vmem (!%p1118_p3), [#allocation2], %s870_s4 }
  0x2b   : > { %1044 = dma.done.wait (%p1144_p11), %s149_s5, 256  }
  0x2c   : > { %1046 = vsyncadd (%p1144_p11), %s149_s5, 4294967040 }
  0x2d   : > { %1048 = dma.done.wait (%p40_p1), [#allocation6], 32768  }
  0x2e   : > { %1050 = vsyncadd (%p40_p1), [#allocation6], 4294934528  ;;  %v302_v0 = vld [vmem:[#allocation5 + $0x3c8] sm:$0xff]  ;;  %v301_v6 = vld [vmem:[#allocation5 + $0x3c0] sm:$0xff]  ;;  %s872_s17 = sshll.u32 %s1179_s29, 6  ;;  %s879_s7 = sshll.u32 %s1113_s16, 6 }
  0x2f   : > { %v430_v1 = vld [vmem:[#allocation5 + $0x7c8] sm:$0xff]  ;;  %477 = vmatpush.msra.mxu2 %v302_v0  ;;  %v429_v7 = vld [vmem:[#allocation5 + $0x7c0] sm:$0xff]  ;;  %437 = vmatpush.msra.mxu0 %v301_v6  ;;  %v304_v60 = vld [vmem:[#allocation5 + $0x3d8] sm:$0xff]  ;;  %s1216_s27 = scalar_lea.vmem [#allocation7], %s872_s17  ;;  %s777_s14 = scalar_lea.hbm %s1261_s2, %s879_s7 }
  0x30   : > { %v294_v2 = vld [vmem:[#allocation5 + $0x388] sm:$0xff]  ;;  %497 = vmatpush.msra.mxu3 %v430_v1  ;;  %v293_v8 = vld [vmem:[#allocation5 + $0x380] sm:$0xff]  ;;  %457 = vmatpush.msra.mxu1 %v429_v7  ;;  %v432_v61 = vld [vmem:[#allocation5 + $0x7d8] sm:$0xff]  ;;  %s779_s15 = sshll.u32 %s1216_s27, 4  ;;  %s781_s18 = sshll.u32 %s777_s14, 4  ;;  %s780_s15 = int_to_ptr.vmem [resolvable:$true] %s779_s15  ;;  %s782_s18 = int_to_ptr.hbm [resolvable:$true] %s781_s18 }
  0x31   : > { %v422_v3 = vld [vmem:[#allocation5 + $0x788] sm:$0xff]  ;;  %478 = vmatpush.msra.mxu2 %v294_v2  ;;  %v421_v9 = vld [vmem:[#allocation5 + $0x780] sm:$0xff]  ;;  %438 = vmatpush.msra.mxu0 %v293_v8  ;;  %v296_v0 = vld [vmem:[#allocation5 + $0x398] sm:$0xff]  ;;  %s766_s19 = scalar_lea.sflag [#allocation4], %s1179_s29  ;;  %s1013_s16 = sshra.s32 %s782_s18, 4  ;;  %s1014_s16 = int_to_ptr.hbm [resolvable:$true] %s1013_s16 }
  0x32   : > { %v286_v4 = vld [vmem:[#allocation5 + $0x348] sm:$0xff]  ;;  %498 = vmatpush.msra.mxu3 %v422_v3  ;;  %v285_v12 = vld [vmem:[#allocation5 + $0x340] sm:$0xff]  ;;  %458 = vmatpush.msra.mxu1 %v421_v9  ;;  %v424_v1 = vld [vmem:[#allocation5 + $0x798] sm:$0xff]  ;;  %s1015_s20 = scalar_lea.hbm %s1014_s16, 64  ;;  %s1019_s24 = scalar_lea.hbm %s1261_s2, 192 }
  0x33   : > { %v414_v5 = vld [vmem:[#allocation5 + $0x748] sm:$0xff]  ;;  %479 = vmatpush.msra.mxu2 %v286_v4  ;;  %v413_v13 = vld [vmem:[#allocation5 + $0x740] sm:$0xff]  ;;  %439 = vmatpush.msra.mxu0 %v285_v12  ;;  %v288_v4 = vld [vmem:[#allocation5 + $0x358] sm:$0xff]  ;;  %p1016_p1 = scmp.ne.s32.totalorder %s1014_s16, %s1015_s20  ;;  %p1020_p5 = scmp.lt.s32.totalorder %s1014_s16, %s1261_s2 }
  0x34   : > { %v278_v10 = vld [vmem:[#allocation5 + $0x308] sm:$0xff]  ;;  %499 = vmatpush.msra.mxu3 %v414_v5  ;;  %v277_v16 = vld [vmem:[#allocation5 + $0x300] sm:$0xff]  ;;  %459 = vmatpush.msra.mxu1 %v413_v13  ;;  %v416_v5 = vld [vmem:[#allocation5 + $0x758] sm:$0xff]  ;;  %p1021_p6 = scmp.lt.s32.totalorder %s1019_s24, %s1015_s20 }
  0x35   : > { %v406_v11 = vld [vmem:[#allocation5 + $0x708] sm:$0xff]  ;;  %480 = vmatpush.msra.mxu2 %v278_v10  ;;  %v405_v17 = vld [vmem:[#allocation5 + $0x700] sm:$0xff]  ;;  %440 = vmatpush.msra.mxu0 %v277_v16  ;;  %v303_v6 = vld [vmem:[#allocation5 + $0x3d0] sm:$0xff]  ;;  %p1017_p3 = pnand %p1016_p1, %p1148_p12 }
  0x36   : > { %v270_v14 = vld [vmem:[#allocation5 + $0x2c8] sm:$0xff]  ;;  %500 = vmatpush.msra.mxu3 %v406_v11  ;;  %v269_v20 = vld [vmem:[#allocation5 + $0x2c0] sm:$0xff]  ;;  %460 = vmatpush.msra.mxu1 %v405_v17  ;;  %v431_v7 = vld [vmem:[#allocation5 + $0x7d0] sm:$0xff]  ;;  %p1022_p7 = por %p1021_p6, %p1020_p5 }
  0x37   : > { %v398_v15 = vld [vmem:[#allocation5 + $0x6c8] sm:$0xff]  ;;  %481 = vmatpush.msra.mxu2 %v270_v14  ;;  %v397_v21 = vld [vmem:[#allocation5 + $0x6c0] sm:$0xff]  ;;  %441 = vmatpush.msra.mxu0 %v269_v20  ;;  %v280_v8 = vld [vmem:[#allocation5 + $0x318] sm:$0xff]  ;;  %p1018_p11 = pneg %p1017_p3 }
  0x38   : > { %v262_v18 = vld [vmem:[#allocation5 + $0x288] sm:$0xff]  ;;  %501 = vmatpush.msra.mxu3 %v398_v15  ;;  %v261_v24 = vld [vmem:[#allocation5 + $0x280] sm:$0xff]  ;;  %461 = vmatpush.msra.mxu1 %v397_v21  ;;  %v408_v9 = vld [vmem:[#allocation5 + $0x718] sm:$0xff] }
  0x39   : > { %v390_v19 = vld [vmem:[#allocation5 + $0x688] sm:$0xff]  ;;  %482 = vmatpush.msra.mxu2 %v262_v18  ;;  %v389_v25 = vld [vmem:[#allocation5 + $0x680] sm:$0xff]  ;;  %442 = vmatpush.msra.mxu0 %v261_v24  ;;  %v295_v10 = vld [vmem:[#allocation5 + $0x390] sm:$0xff]  ;;  %p1023_p8 = pnand %p1022_p7, %p1018_p11 }
  0x3a   : > { %v254_v22 = vld [vmem:[#allocation5 + $0x248] sm:$0xff]  ;;  %502 = vmatpush.msra.mxu3 %v390_v19  ;;  %v253_v28 = vld [vmem:[#allocation5 + $0x240] sm:$0xff]  ;;  %462 = vmatpush.msra.mxu1 %v389_v25  ;;  %v423_v11 = vld [vmem:[#allocation5 + $0x790] sm:$0xff] }
  0x3b   : > { %v382_v23 = vld [vmem:[#allocation5 + $0x648] sm:$0xff]  ;;  %483 = vmatpush.msra.mxu2 %v254_v22  ;;  %v381_v29 = vld [vmem:[#allocation5 + $0x640] sm:$0xff]  ;;  %443 = vmatpush.msra.mxu0 %v253_v28  ;;  %v272_v12 = vld [vmem:[#allocation5 + $0x2d8] sm:$0xff] }
  0x3c   : > { %v246_v26 = vld [vmem:[#allocation5 + $0x208] sm:$0xff]  ;;  %503 = vmatpush.msra.mxu3 %v382_v23  ;;  %v245_v32 = vld [vmem:[#allocation5 + $0x200] sm:$0xff]  ;;  %463 = vmatpush.msra.mxu1 %v381_v29  ;;  %v400_v13 = vld [vmem:[#allocation5 + $0x6d8] sm:$0xff] }
  0x3d   : > { %v374_v27 = vld [vmem:[#allocation5 + $0x608] sm:$0xff]  ;;  %484 = vmatpush.msra.mxu2 %v246_v26  ;;  %v373_v33 = vld [vmem:[#allocation5 + $0x600] sm:$0xff]  ;;  %444 = vmatpush.msra.mxu0 %v245_v32  ;;  %v287_v14 = vld [vmem:[#allocation5 + $0x350] sm:$0xff] }
  0x3e   : > { %v238_v30 = vld [vmem:[#allocation5 + $0x1c8] sm:$0xff]  ;;  %504 = vmatpush.msra.mxu3 %v374_v27  ;;  %v237_v36 = vld [vmem:[#allocation5 + $0x1c0] sm:$0xff]  ;;  %464 = vmatpush.msra.mxu1 %v373_v33  ;;  %v415_v15 = vld [vmem:[#allocation5 + $0x750] sm:$0xff] }
  0x3f   : > { %v366_v31 = vld [vmem:[#allocation5 + $0x5c8] sm:$0xff]  ;;  %485 = vmatpush.msra.mxu2 %v238_v30  ;;  %v365_v37 = vld [vmem:[#allocation5 + $0x5c0] sm:$0xff]  ;;  %445 = vmatpush.msra.mxu0 %v237_v36  ;;  %v264_v16 = vld [vmem:[#allocation5 + $0x298] sm:$0xff] }
  0x40   : > { %v230_v34 = vld [vmem:[#allocation5 + $0x188] sm:$0xff]  ;;  %505 = vmatpush.msra.mxu3 %v366_v31  ;;  %v229_v40 = vld [vmem:[#allocation5 + $0x180] sm:$0xff]  ;;  %465 = vmatpush.msra.mxu1 %v365_v37  ;;  %v392_v17 = vld [vmem:[#allocation5 + $0x698] sm:$0xff] }
  0x41   : > { %v358_v35 = vld [vmem:[#allocation5 + $0x588] sm:$0xff]  ;;  %486 = vmatpush.msra.mxu2 %v230_v34  ;;  %v357_v41 = vld [vmem:[#allocation5 + $0x580] sm:$0xff]  ;;  %446 = vmatpush.msra.mxu0 %v229_v40  ;;  %v279_v18 = vld [vmem:[#allocation5 + $0x310] sm:$0xff] }
  0x42   : > { %v222_v38 = vld [vmem:[#allocation5 + $0x148] sm:$0xff]  ;;  %506 = vmatpush.msra.mxu3 %v358_v35  ;;  %v221_v44 = vld [vmem:[#allocation5 + $0x140] sm:$0xff]  ;;  %466 = vmatpush.msra.mxu1 %v357_v41  ;;  %v407_v19 = vld [vmem:[#allocation5 + $0x710] sm:$0xff] }
  0x43   : > { %v350_v39 = vld [vmem:[#allocation5 + $0x548] sm:$0xff]  ;;  %487 = vmatpush.msra.mxu2 %v222_v38  ;;  %v349_v45 = vld [vmem:[#allocation5 + $0x540] sm:$0xff]  ;;  %447 = vmatpush.msra.mxu0 %v221_v44  ;;  %v256_v20 = vld [vmem:[#allocation5 + $0x258] sm:$0xff] }
  0x44   : > { %v214_v42 = vld [vmem:[#allocation5 + $0x108] sm:$0xff]  ;;  %507 = vmatpush.msra.mxu3 %v350_v39  ;;  %v213_v48 = vld [vmem:[#allocation5 + $0x100] sm:$0xff]  ;;  %467 = vmatpush.msra.mxu1 %v349_v45  ;;  %v384_v21 = vld [vmem:[#allocation5 + $0x658] sm:$0xff] }
  0x45   : > { %v342_v43 = vld [vmem:[#allocation5 + $0x508] sm:$0xff]  ;;  %488 = vmatpush.msra.mxu2 %v214_v42  ;;  %v341_v49 = vld [vmem:[#allocation5 + $0x500] sm:$0xff]  ;;  %448 = vmatpush.msra.mxu0 %v213_v48  ;;  %v271_v22 = vld [vmem:[#allocation5 + $0x2d0] sm:$0xff] }
  0x46   : > { %v206_v46 = vld [vmem:[#allocation5 + $0xc8] sm:$0xff]  ;;  %508 = vmatpush.msra.mxu3 %v342_v43  ;;  %v205_v52 = vld [vmem:[#allocation5 + $0xc0] sm:$0xff]  ;;  %468 = vmatpush.msra.mxu1 %v341_v49  ;;  %v399_v23 = vld [vmem:[#allocation5 + $0x6d0] sm:$0xff] }
  0x47   : > { %v334_v47 = vld [vmem:[#allocation5 + $0x4c8] sm:$0xff]  ;;  %489 = vmatpush.msra.mxu2 %v206_v46  ;;  %v333_v53 = vld [vmem:[#allocation5 + $0x4c0] sm:$0xff]  ;;  %449 = vmatpush.msra.mxu0 %v205_v52  ;;  %v248_v24 = vld [vmem:[#allocation5 + $0x218] sm:$0xff] }
  0x48   : > { %v198_v50 = vld [vmem:[#allocation5 + $0x88] sm:$0xff]  ;;  %509 = vmatpush.msra.mxu3 %v334_v47  ;;  %v197_v56 = vld [vmem:[#allocation5 + $0x80] sm:$0xff]  ;;  %469 = vmatpush.msra.mxu1 %v333_v53  ;;  %v376_v25 = vld [vmem:[#allocation5 + $0x618] sm:$0xff] }
  0x49   : > { %v326_v51 = vld [vmem:[#allocation5 + $0x488] sm:$0xff]  ;;  %490 = vmatpush.msra.mxu2 %v198_v50  ;;  %v325_v57 = vld [vmem:[#allocation5 + $0x480] sm:$0xff]  ;;  %450 = vmatpush.msra.mxu0 %v197_v56  ;;  %v263_v26 = vld [vmem:[#allocation5 + $0x290] sm:$0xff] }
  0x4a   : > { %v190_v54 = vld [vmem:[#allocation5 + $0x48] sm:$0xff]  ;;  %510 = vmatpush.msra.mxu3 %v326_v51  ;;  %470 = vmatpush.msra.mxu1 %v325_v57  ;;  %v189_v62 = vld [vmem:[#allocation5 + $0x40] sm:$0xff]  ;;  %v391_v27 = vld [vmem:[#allocation5 + $0x690] sm:$0xff] }
  0x4b   : > { %v318_v55 = vld [vmem:[#allocation5 + $0x448] sm:$0xff]  ;;  %491 = vmatpush.msra.mxu2 %v190_v54  ;;  %v317_v63 = vld [vmem:[#allocation5 + $0x440] sm:$0xff]  ;;  %451 = vmatpush.msra.mxu0 %v189_v62  ;;  %v240_v28 = vld [vmem:[#allocation5 + $0x1d8] sm:$0xff] }
  0x4c   : > { %v182_v58 = vld [vmem:[#allocation5 + $0x8] sm:$0xff]  ;;  %511 = vmatpush.msra.mxu3 %v318_v55  ;;  %v181_v2 = vld [vmem:[#allocation5] sm:$0xff]  ;;  %471 = vmatpush.msra.mxu1 %v317_v63  ;;  %v368_v29 = vld [vmem:[#allocation5 + $0x5d8] sm:$0xff] }
  0x4d   : > { %v310_v59 = vld [vmem:[#allocation5 + $0x408] sm:$0xff]  ;;  %492 = vmatpush.msra.mxu2 %v182_v58  ;;  %v309_v3 = vld [vmem:[#allocation5 + $0x400] sm:$0xff]  ;;  %452 = vmatpush.msra.mxu0 %v181_v2  ;;  %v255_v30 = vld [vmem:[#allocation5 + $0x250] sm:$0xff] }
  0x4e   : > { %512 = vmatpush.msra.mxu3 %v310_v59  ;;  %472 = vmatpush.msra.mxu1 %v309_v3  ;;  %v383_v31 = vld [vmem:[#allocation5 + $0x650] sm:$0xff]  ;;  %v232_v32 = vld [vmem:[#allocation5 + $0x198] sm:$0xff] }
  0x4f   : > { %557 = vmatpush.msrb.mxu2 %v304_v60  ;;  %517 = vmatpush.msrb.mxu0 %v303_v6  ;;  %v360_v33 = vld [vmem:[#allocation5 + $0x598] sm:$0xff]  ;;  %v247_v34 = vld [vmem:[#allocation5 + $0x210] sm:$0xff]  ;;  %v306_v60 = vld [vmem:[#allocation5 + $0x3e8] sm:$0xff] }
  0x50   : > { %577 = vmatpush.msrb.mxu3 %v432_v61  ;;  %537 = vmatpush.msrb.mxu1 %v431_v7  ;;  %v375_v35 = vld [vmem:[#allocation5 + $0x610] sm:$0xff]  ;;  %v224_v36 = vld [vmem:[#allocation5 + $0x158] sm:$0xff]  ;;  %v434_v61 = vld [vmem:[#allocation5 + $0x7e8] sm:$0xff] }
  0x51   : > { %558 = vmatpush.msrb.mxu2 %v296_v0  ;;  %518 = vmatpush.msrb.mxu0 %v295_v10  ;;  %v352_v37 = vld [vmem:[#allocation5 + $0x558] sm:$0xff]  ;;  %v239_v38 = vld [vmem:[#allocation5 + $0x1d0] sm:$0xff]  ;;  %v298_v0 = vld [vmem:[#allocation5 + $0x3a8] sm:$0xff] }
  0x52   : > { %578 = vmatpush.msrb.mxu3 %v424_v1  ;;  %538 = vmatpush.msrb.mxu1 %v423_v11  ;;  %v367_v39 = vld [vmem:[#allocation5 + $0x5d0] sm:$0xff]  ;;  %v216_v40 = vld [vmem:[#allocation5 + $0x118] sm:$0xff]  ;;  %v426_v1 = vld [vmem:[#allocation5 + $0x7a8] sm:$0xff] }
  0x53   : > { %559 = vmatpush.msrb.mxu2 %v288_v4  ;;  %519 = vmatpush.msrb.mxu0 %v287_v14  ;;  %v344_v41 = vld [vmem:[#allocation5 + $0x518] sm:$0xff]  ;;  %v231_v42 = vld [vmem:[#allocation5 + $0x190] sm:$0xff]  ;;  %v290_v4 = vld [vmem:[#allocation5 + $0x368] sm:$0xff] }
  0x54   : > { %579 = vmatpush.msrb.mxu3 %v416_v5  ;;  %539 = vmatpush.msrb.mxu1 %v415_v15  ;;  %v359_v43 = vld [vmem:[#allocation5 + $0x590] sm:$0xff]  ;;  %v208_v44 = vld [vmem:[#allocation5 + $0xd8] sm:$0xff]  ;;  %v418_v5 = vld [vmem:[#allocation5 + $0x768] sm:$0xff] }
  0x55   : > { %560 = vmatpush.msrb.mxu2 %v280_v8  ;;  %520 = vmatpush.msrb.mxu0 %v279_v18  ;;  %v336_v45 = vld [vmem:[#allocation5 + $0x4d8] sm:$0xff]  ;;  %v223_v46 = vld [vmem:[#allocation5 + $0x150] sm:$0xff]  ;;  %v305_v8 = vld [vmem:[#allocation5 + $0x3e0] sm:$0xff] }
  0x56   : > { %580 = vmatpush.msrb.mxu3 %v408_v9  ;;  %540 = vmatpush.msrb.mxu1 %v407_v19  ;;  %v351_v47 = vld [vmem:[#allocation5 + $0x550] sm:$0xff]  ;;  %v200_v48 = vld [vmem:[#allocation5 + $0x98] sm:$0xff]  ;;  %v433_v9 = vld [vmem:[#allocation5 + $0x7e0] sm:$0xff] }
  0x57   : > { %561 = vmatpush.msrb.mxu2 %v272_v12  ;;  %521 = vmatpush.msrb.mxu0 %v271_v22  ;;  %v328_v49 = vld [vmem:[#allocation5 + $0x498] sm:$0xff]  ;;  %v215_v50 = vld [vmem:[#allocation5 + $0x110] sm:$0xff]  ;;  %v282_v10 = vld [vmem:[#allocation5 + $0x328] sm:$0xff] }
  0x58   : > { %581 = vmatpush.msrb.mxu3 %v400_v13  ;;  %541 = vmatpush.msrb.mxu1 %v399_v23  ;;  %v343_v51 = vld [vmem:[#allocation5 + $0x510] sm:$0xff]  ;;  %v192_v52 = vld [vmem:[#allocation5 + $0x58] sm:$0xff]  ;;  %v410_v11 = vld [vmem:[#allocation5 + $0x728] sm:$0xff] }
  0x59   : > { %562 = vmatpush.msrb.mxu2 %v264_v16  ;;  %522 = vmatpush.msrb.mxu0 %v263_v26  ;;  %v320_v53 = vld [vmem:[#allocation5 + $0x458] sm:$0xff]  ;;  %v207_v54 = vld [vmem:[#allocation5 + $0xd0] sm:$0xff]  ;;  %v297_v12 = vld [vmem:[#allocation5 + $0x3a0] sm:$0xff] }
  0x5a   : > { %582 = vmatpush.msrb.mxu3 %v392_v17  ;;  %542 = vmatpush.msrb.mxu1 %v391_v27  ;;  %v335_v55 = vld [vmem:[#allocation5 + $0x4d0] sm:$0xff]  ;;  %v184_v56 = vld [vmem:[#allocation5 + $0x18] sm:$0xff]  ;;  %v425_v13 = vld [vmem:[#allocation5 + $0x7a0] sm:$0xff] }
  0x5b   : > { %563 = vmatpush.msrb.mxu2 %v256_v20  ;;  %523 = vmatpush.msrb.mxu0 %v255_v30  ;;  %v312_v57 = vld [vmem:[#allocation5 + $0x418] sm:$0xff]  ;;  %v1194_v58 = vld [vmem:[%s1183_s6] sm:$0xff]  ;;  %v274_v14 = vld [vmem:[#allocation5 + $0x2e8] sm:$0xff] }
  0x5c   : > { %583 = vmatpush.msrb.mxu3 %v384_v21  ;;  %543 = vmatpush.msrb.mxu1 %v383_v31  ;;  %v1197_v59 = vld [vmem:[%s1183_s6 + $0x8] sm:$0xff]  ;;  %v199_v62 = vld [vmem:[#allocation5 + $0x90] sm:$0xff]  ;;  %v289_v16 = vld [vmem:[#allocation5 + $0x360] sm:$0xff] }
  0x5d   : > { %564 = vmatpush.msrb.mxu2 %v248_v24  ;;  %524 = vmatpush.msrb.mxu0 %v247_v34  ;;  %v327_v63 = vld [vmem:[#allocation5 + $0x490] sm:$0xff]  ;;  %v402_v15 = vld [vmem:[#allocation5 + $0x6e8] sm:$0xff]  ;;  %v417_v17 = vld [vmem:[#allocation5 + $0x760] sm:$0xff] }
  0x5e   : > { %584 = vmatpush.msrb.mxu3 %v376_v25  ;;  %544 = vmatpush.msrb.mxu1 %v375_v35  ;;  %v191_v2 = vld [vmem:[#allocation5 + $0x50] sm:$0xff]  ;;  %v266_v18 = vld [vmem:[#allocation5 + $0x2a8] sm:$0xff]  ;;  %v281_v20 = vld [vmem:[#allocation5 + $0x320] sm:$0xff] }
  0x5f   : > { %565 = vmatpush.msrb.mxu2 %v240_v28  ;;  %525 = vmatpush.msrb.mxu0 %v239_v38  ;;  %v319_v3 = vld [vmem:[#allocation5 + $0x450] sm:$0xff]  ;;  %v394_v19 = vld [vmem:[#allocation5 + $0x6a8] sm:$0xff]  ;;  %v409_v21 = vld [vmem:[#allocation5 + $0x720] sm:$0xff] }
  0x60   : > { %585 = vmatpush.msrb.mxu3 %v368_v29  ;;  %545 = vmatpush.msrb.mxu1 %v367_v39  ;;  %v183_v6 = vld [vmem:[#allocation5 + $0x10] sm:$0xff]  ;;  %v258_v22 = vld [vmem:[#allocation5 + $0x268] sm:$0xff]  ;;  %v273_v24 = vld [vmem:[#allocation5 + $0x2e0] sm:$0xff] }
  0x61   : > { %566 = vmatpush.msrb.mxu2 %v232_v32  ;;  %526 = vmatpush.msrb.mxu0 %v231_v42  ;;  %v311_v7 = vld [vmem:[#allocation5 + $0x410] sm:$0xff]  ;;  %v386_v23 = vld [vmem:[#allocation5 + $0x668] sm:$0xff]  ;;  %v401_v25 = vld [vmem:[#allocation5 + $0x6e0] sm:$0xff] }
  0x62   : > { %586 = vmatpush.msrb.mxu3 %v360_v33  ;;  %546 = vmatpush.msrb.mxu1 %v359_v43  ;;  %v250_v26 = vld [vmem:[#allocation5 + $0x228] sm:$0xff]  ;;  %v265_v28 = vld [vmem:[#allocation5 + $0x2a0] sm:$0xff] }
  0x63   : > { %567 = vmatpush.msrb.mxu2 %v224_v36  ;;  %527 = vmatpush.msrb.mxu0 %v223_v46  ;;  %v378_v27 = vld [vmem:[#allocation5 + $0x628] sm:$0xff]  ;;  %v393_v29 = vld [vmem:[#allocation5 + $0x6a0] sm:$0xff] }
  0x64   : > { %587 = vmatpush.msrb.mxu3 %v352_v37  ;;  %547 = vmatpush.msrb.mxu1 %v351_v47  ;;  %v242_v30 = vld [vmem:[#allocation5 + $0x1e8] sm:$0xff]  ;;  %v257_v32 = vld [vmem:[#allocation5 + $0x260] sm:$0xff] }
  0x65   : > { %568 = vmatpush.msrb.mxu2 %v216_v40  ;;  %528 = vmatpush.msrb.mxu0 %v215_v50  ;;  %v370_v31 = vld [vmem:[#allocation5 + $0x5e8] sm:$0xff]  ;;  %v385_v33 = vld [vmem:[#allocation5 + $0x660] sm:$0xff] }
  0x66   : > { %588 = vmatpush.msrb.mxu3 %v344_v41  ;;  %548 = vmatpush.msrb.mxu1 %v343_v51  ;;  %v234_v34 = vld [vmem:[#allocation5 + $0x1a8] sm:$0xff]  ;;  %v249_v36 = vld [vmem:[#allocation5 + $0x220] sm:$0xff] }
  0x67   : > { %569 = vmatpush.msrb.mxu2 %v208_v44  ;;  %529 = vmatpush.msrb.mxu0 %v207_v54  ;;  %v362_v35 = vld [vmem:[#allocation5 + $0x5a8] sm:$0xff]  ;;  %v377_v37 = vld [vmem:[#allocation5 + $0x620] sm:$0xff] }
  0x68   : > { %589 = vmatpush.msrb.mxu3 %v336_v45  ;;  %549 = vmatpush.msrb.mxu1 %v335_v55  ;;  %v226_v38 = vld [vmem:[#allocation5 + $0x168] sm:$0xff]  ;;  %v241_v40 = vld [vmem:[#allocation5 + $0x1e0] sm:$0xff] }
  0x69   : > { %570 = vmatpush.msrb.mxu2 %v200_v48  ;;  %513 = vmatmul.f32.vlgmr.msra.gmra.mxu3 %v1197_v59  ;;  %v354_v39 = vld [vmem:[#allocation5 + $0x568] sm:$0xff]  ;;  %v369_v41 = vld [vmem:[#allocation5 + $0x5e0] sm:$0xff] }
  0x6a   : > { %590 = vmatpush.msrb.mxu3 %v328_v49  ;;  %493 = vmatmul.f32.vlgmr.msra.gmra.mxu2 %v1194_v58  ;;  %v218_v42 = vld [vmem:[#allocation5 + $0x128] sm:$0xff]  ;;  %v233_v44 = vld [vmem:[#allocation5 + $0x1a0] sm:$0xff] }
  0x6b   : > { %571 = vmatpush.msrb.mxu2 %v192_v52  ;;  %530 = vmatpush.msrb.mxu0 %v199_v62  ;;  %v346_v43 = vld [vmem:[#allocation5 + $0x528] sm:$0xff]  ;;  %v361_v45 = vld [vmem:[#allocation5 + $0x5a0] sm:$0xff]  ;;  %v308_v62 = vld [vmem:[#allocation5 + $0x3f8] sm:$0xff] }
  0x6c   : > { %591 = vmatpush.msrb.mxu3 %v320_v53  ;;  %550 = vmatpush.msrb.mxu1 %v327_v63  ;;  %v210_v46 = vld [vmem:[#allocation5 + $0xe8] sm:$0xff]  ;;  %v225_v48 = vld [vmem:[#allocation5 + $0x160] sm:$0xff]  ;;  %v436_v63 = vld [vmem:[#allocation5 + $0x7f8] sm:$0xff] }
  0x6d   : > { %572 = vmatpush.msrb.mxu2 %v184_v56  ;;  %531 = vmatpush.msrb.mxu0 %v191_v2  ;;  %v338_v47 = vld [vmem:[#allocation5 + $0x4e8] sm:$0xff]  ;;  %v353_v49 = vld [vmem:[#allocation5 + $0x560] sm:$0xff]  ;;  %v300_v2 = vld [vmem:[#allocation5 + $0x3b8] sm:$0xff] }
  0x6e   : > { %592 = vmatpush.msrb.mxu3 %v312_v57  ;;  %551 = vmatpush.msrb.mxu1 %v319_v3  ;;  %v202_v50 = vld [vmem:[#allocation5 + $0xa8] sm:$0xff]  ;;  %v217_v52 = vld [vmem:[#allocation5 + $0x120] sm:$0xff]  ;;  %v428_v3 = vld [vmem:[#allocation5 + $0x7b8] sm:$0xff] }
  0x6f   : > { %637 = vmatpush.msra.mxu2 %v306_v60  ;;  %532 = vmatpush.msrb.mxu0 %v183_v6  ;;  %v330_v51 = vld [vmem:[#allocation5 + $0x4a8] sm:$0xff]  ;;  %v345_v53 = vld [vmem:[#allocation5 + $0x520] sm:$0xff]  ;;  %v292_v6 = vld [vmem:[#allocation5 + $0x378] sm:$0xff] }
  0x70   : > { %657 = vmatpush.msra.mxu3 %v434_v61  ;;  %552 = vmatpush.msrb.mxu1 %v311_v7  ;;  %v194_v54 = vld [vmem:[#allocation5 + $0x68] sm:$0xff]  ;;  %v209_v56 = vld [vmem:[#allocation5 + $0xe0] sm:$0xff]  ;;  %v420_v7 = vld [vmem:[#allocation5 + $0x778] sm:$0xff] }
  0x71   : > { %638 = vmatpush.msra.mxu2 %v298_v0  ;;  %453 = vmatmul.f32.vlgmr.msra.gmra.mxu0 %v1194_v58  ;;  %v322_v55 = vld [vmem:[#allocation5 + $0x468] sm:$0xff]  ;;  %v337_v57 = vld [vmem:[#allocation5 + $0x4e0] sm:$0xff] }
  0x72   : > { %658 = vmatpush.msra.mxu3 %v426_v1  ;;  %473 = vmatmul.f32.vlgmr.msra.gmra.mxu1 %v1197_v59  ;;  %v186_v60 = vld [vmem:[#allocation5 + $0x28] sm:$0xff]  ;;  %v201_v0 = vld [vmem:[#allocation5 + $0xa0] sm:$0xff] }
  0x73   : > { %639 = vmatpush.msra.mxu2 %v290_v4  ;;  %597 = vmatpush.msra.mxu0 %v305_v8  ;;  %v314_v61 = vld [vmem:[#allocation5 + $0x428] sm:$0xff]  ;;  %v329_v1 = vld [vmem:[#allocation5 + $0x4a0] sm:$0xff] }
  0x74   : > { %659 = vmatpush.msra.mxu3 %v418_v5  ;;  %617 = vmatpush.msra.mxu1 %v433_v9  ;;  %v193_v4 = vld [vmem:[#allocation5 + $0x60] sm:$0xff] }
  0x75   : > { %640 = vmatpush.msra.mxu2 %v282_v10  ;;  %598 = vmatpush.msra.mxu0 %v297_v12  ;;  %v321_v5 = vld [vmem:[#allocation5 + $0x460] sm:$0xff]  ;;  %v307_v10 = vld [vmem:[#allocation5 + $0x3f0] sm:$0xff]  ;;  %v284_v12 = vld [vmem:[#allocation5 + $0x338] sm:$0xff] }
  0x76   : > { %660 = vmatpush.msra.mxu3 %v410_v11  ;;  %618 = vmatpush.msra.mxu1 %v425_v13  ;;  %v185_v8 = vld [vmem:[#allocation5 + $0x20] sm:$0xff]  ;;  %v435_v11 = vld [vmem:[#allocation5 + $0x7f0] sm:$0xff]  ;;  %v412_v13 = vld [vmem:[#allocation5 + $0x738] sm:$0xff] }
  0x77   : > { %641 = vmatpush.msra.mxu2 %v274_v14  ;;  %599 = vmatpush.msra.mxu0 %v289_v16  ;;  %v313_v9 = vld [vmem:[#allocation5 + $0x420] sm:$0xff]  ;;  %v299_v14 = vld [vmem:[#allocation5 + $0x3b0] sm:$0xff]  ;;  %v276_v16 = vld [vmem:[#allocation5 + $0x2f8] sm:$0xff] }
  0x78   : > { %661 = vmatpush.msra.mxu3 %v402_v15  ;;  %619 = vmatpush.msra.mxu1 %v417_v17  ;;  %v427_v15 = vld [vmem:[#allocation5 + $0x7b0] sm:$0xff]  ;;  %v404_v17 = vld [vmem:[#allocation5 + $0x6f8] sm:$0xff] }
  0x79   : > { %642 = vmatpush.msra.mxu2 %v266_v18  ;;  %600 = vmatpush.msra.mxu0 %v281_v20  ;;  %v291_v18 = vld [vmem:[#allocation5 + $0x370] sm:$0xff]  ;;  %v268_v20 = vld [vmem:[#allocation5 + $0x2b8] sm:$0xff] }
  0x7a   : > { %662 = vmatpush.msra.mxu3 %v394_v19  ;;  %620 = vmatpush.msra.mxu1 %v409_v21  ;;  %v419_v19 = vld [vmem:[#allocation5 + $0x770] sm:$0xff]  ;;  %v396_v21 = vld [vmem:[#allocation5 + $0x6b8] sm:$0xff] }
  0x7b   : > { %643 = vmatpush.msra.mxu2 %v258_v22  ;;  %601 = vmatpush.msra.mxu0 %v273_v24  ;;  %v283_v22 = vld [vmem:[#allocation5 + $0x330] sm:$0xff]  ;;  %v260_v24 = vld [vmem:[#allocation5 + $0x278] sm:$0xff] }
  0x7c   : > { %663 = vmatpush.msra.mxu3 %v386_v23  ;;  %621 = vmatpush.msra.mxu1 %v401_v25  ;;  %v411_v23 = vld [vmem:[#allocation5 + $0x730] sm:$0xff]  ;;  %v388_v25 = vld [vmem:[#allocation5 + $0x678] sm:$0xff] }
  0x7d   : > { %644 = vmatpush.msra.mxu2 %v250_v26  ;;  %602 = vmatpush.msra.mxu0 %v265_v28  ;;  %v275_v26 = vld [vmem:[#allocation5 + $0x2f0] sm:$0xff]  ;;  %v252_v28 = vld [vmem:[#allocation5 + $0x238] sm:$0xff] }
  0x7e   : > { %664 = vmatpush.msra.mxu3 %v378_v27  ;;  %622 = vmatpush.msra.mxu1 %v393_v29  ;;  %v403_v27 = vld [vmem:[#allocation5 + $0x6f0] sm:$0xff]  ;;  %v380_v29 = vld [vmem:[#allocation5 + $0x638] sm:$0xff] }
  0x7f   : > { %645 = vmatpush.msra.mxu2 %v242_v30  ;;  %603 = vmatpush.msra.mxu0 %v257_v32  ;;  %v267_v30 = vld [vmem:[#allocation5 + $0x2b0] sm:$0xff]  ;;  %v244_v32 = vld [vmem:[#allocation5 + $0x1f8] sm:$0xff] }
  0x80   : > { %665 = vmatpush.msra.mxu3 %v370_v31  ;;  %623 = vmatpush.msra.mxu1 %v385_v33  ;;  %v395_v31 = vld [vmem:[#allocation5 + $0x6b0] sm:$0xff]  ;;  %v372_v33 = vld [vmem:[#allocation5 + $0x5f8] sm:$0xff] }
  0x81   : > { %646 = vmatpush.msra.mxu2 %v234_v34  ;;  %604 = vmatpush.msra.mxu0 %v249_v36  ;;  %v259_v34 = vld [vmem:[#allocation5 + $0x270] sm:$0xff]  ;;  %v236_v36 = vld [vmem:[#allocation5 + $0x1b8] sm:$0xff] }
  0x82   : > { %666 = vmatpush.msra.mxu3 %v362_v35  ;;  %624 = vmatpush.msra.mxu1 %v377_v37  ;;  %v387_v35 = vld [vmem:[#allocation5 + $0x670] sm:$0xff]  ;;  %v364_v37 = vld [vmem:[#allocation5 + $0x5b8] sm:$0xff] }
  0x83   : > { %647 = vmatpush.msra.mxu2 %v226_v38  ;;  %605 = vmatpush.msra.mxu0 %v241_v40  ;;  %v251_v38 = vld [vmem:[#allocation5 + $0x230] sm:$0xff]  ;;  %v228_v40 = vld [vmem:[#allocation5 + $0x178] sm:$0xff] }
  0x84   : > { %667 = vmatpush.msra.mxu3 %v354_v39  ;;  %625 = vmatpush.msra.mxu1 %v369_v41  ;;  %v379_v39 = vld [vmem:[#allocation5 + $0x630] sm:$0xff]  ;;  %v356_v41 = vld [vmem:[#allocation5 + $0x578] sm:$0xff] }
  0x85   : > { %648 = vmatpush.msra.mxu2 %v218_v42  ;;  %606 = vmatpush.msra.mxu0 %v233_v44  ;;  %v243_v42 = vld [vmem:[#allocation5 + $0x1f0] sm:$0xff]  ;;  %v220_v44 = vld [vmem:[#allocation5 + $0x138] sm:$0xff] }
  0x86   : > { %668 = vmatpush.msra.mxu3 %v346_v43  ;;  %626 = vmatpush.msra.mxu1 %v361_v45  ;;  %v371_v43 = vld [vmem:[#allocation5 + $0x5f0] sm:$0xff]  ;;  %v348_v45 = vld [vmem:[#allocation5 + $0x538] sm:$0xff] }
  0x87   : > { %649 = vmatpush.msra.mxu2 %v210_v46  ;;  %607 = vmatpush.msra.mxu0 %v225_v48  ;;  %v235_v46 = vld [vmem:[#allocation5 + $0x1b0] sm:$0xff]  ;;  %v212_v48 = vld [vmem:[#allocation5 + $0xf8] sm:$0xff] }
  0x88   : > { %669 = vmatpush.msra.mxu3 %v338_v47  ;;  %627 = vmatpush.msra.mxu1 %v353_v49  ;;  %v363_v47 = vld [vmem:[#allocation5 + $0x5b0] sm:$0xff]  ;;  %v340_v49 = vld [vmem:[#allocation5 + $0x4f8] sm:$0xff] }
  0x89   : > { %650 = vmatpush.msra.mxu2 %v202_v50  ;;  %608 = vmatpush.msra.mxu0 %v217_v52  ;;  %v227_v50 = vld [vmem:[#allocation5 + $0x170] sm:$0xff]  ;;  %v204_v52 = vld [vmem:[#allocation5 + $0xb8] sm:$0xff] }
  0x8a   : > { %670 = vmatpush.msra.mxu3 %v330_v51  ;;  %628 = vmatpush.msra.mxu1 %v345_v53  ;;  %v355_v51 = vld [vmem:[#allocation5 + $0x570] sm:$0xff]  ;;  %v332_v53 = vld [vmem:[#allocation5 + $0x4b8] sm:$0xff] }
  0x8b   : > { %651 = vmatpush.msra.mxu2 %v194_v54  ;;  %609 = vmatpush.msra.mxu0 %v209_v56  ;;  %v219_v54 = vld [vmem:[#allocation5 + $0x130] sm:$0xff]  ;;  %v196_v56 = vld [vmem:[#allocation5 + $0x78] sm:$0xff] }
  0x8c   : > { %671 = vmatpush.msra.mxu3 %v322_v55  ;;  %629 = vmatpush.msra.mxu1 %v337_v57  ;;  %v347_v55 = vld [vmem:[#allocation5 + $0x530] sm:$0xff]  ;;  %v324_v57 = vld [vmem:[#allocation5 + $0x478] sm:$0xff] }
  0x8d   : > { %652 = vmatpush.msra.mxu2 %v186_v60  ;;  %593 = vmatmul.f32.vlgmr.msrb.gmra.mxu3 %v1197_v59  ;;  %v211_v60 = vld [vmem:[#allocation5 + $0xf0] sm:$0xff] }
  0x8e   : > { %672 = vmatpush.msra.mxu3 %v314_v61  ;;  %573 = vmatmul.f32.vlgmr.msrb.gmra.mxu2 %v1194_v58  ;;  %v339_v61 = vld [vmem:[#allocation5 + $0x4f0] sm:$0xff] }
  0x8f   : > { %717 = vmatpush.msrb.mxu2 %v308_v62  ;;  %610 = vmatpush.msra.mxu0 %v201_v0  ;;  %v188_v62 = vld [vmem:[#allocation5 + $0x38] sm:$0xff]  ;;  %v203_v0 = vld [vmem:[#allocation5 + $0xb0] sm:$0xff] }
  0x90   : > { %737 = vmatpush.msrb.mxu3 %v436_v63  ;;  %630 = vmatpush.msra.mxu1 %v329_v1  ;;  %v316_v63 = vld [vmem:[#allocation5 + $0x438] sm:$0xff]  ;;  %v331_v1 = vld [vmem:[#allocation5 + $0x4b0] sm:$0xff] }
  0x91   : > { %718 = vmatpush.msrb.mxu2 %v300_v2  ;;  %611 = vmatpush.msra.mxu0 %v193_v4  ;;  %v195_v2 = vld [vmem:[#allocation5 + $0x70] sm:$0xff] }
  0x92   : > { %738 = vmatpush.msrb.mxu3 %v428_v3  ;;  %631 = vmatpush.msra.mxu1 %v321_v5  ;;  %v323_v3 = vld [vmem:[#allocation5 + $0x470] sm:$0xff] }
  0x93   : > { %719 = vmatpush.msrb.mxu2 %v292_v6  ;;  %612 = vmatpush.msra.mxu0 %v185_v8  ;;  %v187_v4 = vld [vmem:[#allocation5 + $0x30] sm:$0xff] }
  0x94   : > { %739 = vmatpush.msrb.mxu3 %v420_v7  ;;  %632 = vmatpush.msra.mxu1 %v313_v9  ;;  %v315_v5 = vld [vmem:[#allocation5 + $0x430] sm:$0xff] }
  0x95   : > { %533 = vmatmul.f32.vlgmr.msrb.gmra.mxu0 %v1194_v58  ;;  %553 = vmatmul.f32.vlgmr.msrb.gmra.mxu1 %v1197_v59 }
  0x96   : > { %677 = vmatpush.msrb.mxu0 %v307_v10  ;;  %697 = vmatpush.msrb.mxu1 %v435_v11 }
  0x97   : > { %720 = vmatpush.msrb.mxu2 %v284_v12  ;;  %740 = vmatpush.msrb.mxu3 %v412_v13 }
  0x98   : > { %678 = vmatpush.msrb.mxu0 %v299_v14  ;;  %698 = vmatpush.msrb.mxu1 %v427_v15 }
  0x99   : > { %721 = vmatpush.msrb.mxu2 %v276_v16  ;;  %741 = vmatpush.msrb.mxu3 %v404_v17 }
  0x9a   : > { %679 = vmatpush.msrb.mxu0 %v291_v18  ;;  %699 = vmatpush.msrb.mxu1 %v419_v19 }
  0x9b   : > { %722 = vmatpush.msrb.mxu2 %v268_v20  ;;  %742 = vmatpush.msrb.mxu3 %v396_v21 }
  0x9c   : > { %680 = vmatpush.msrb.mxu0 %v283_v22  ;;  %700 = vmatpush.msrb.mxu1 %v411_v23 }
  0x9d   : > { %723 = vmatpush.msrb.mxu2 %v260_v24  ;;  %743 = vmatpush.msrb.mxu3 %v388_v25 }
  0x9e   : > { %681 = vmatpush.msrb.mxu0 %v275_v26  ;;  %701 = vmatpush.msrb.mxu1 %v403_v27 }
  0x9f   : > { %724 = vmatpush.msrb.mxu2 %v252_v28  ;;  %744 = vmatpush.msrb.mxu3 %v380_v29 }
  0xa0   : > { %682 = vmatpush.msrb.mxu0 %v267_v30  ;;  %702 = vmatpush.msrb.mxu1 %v395_v31 }
  0xa1   : > { %725 = vmatpush.msrb.mxu2 %v244_v32  ;;  %745 = vmatpush.msrb.mxu3 %v372_v33 }
  0xa2   : > { %683 = vmatpush.msrb.mxu0 %v259_v34  ;;  %703 = vmatpush.msrb.mxu1 %v387_v35 }
  0xa3   : > { %726 = vmatpush.msrb.mxu2 %v236_v36  ;;  %746 = vmatpush.msrb.mxu3 %v364_v37 }
  0xa4   : > { %684 = vmatpush.msrb.mxu0 %v251_v38  ;;  %704 = vmatpush.msrb.mxu1 %v379_v39 }
  0xa5   : > { %727 = vmatpush.msrb.mxu2 %v228_v40  ;;  %747 = vmatpush.msrb.mxu3 %v356_v41 }
  0xa6   : > { %685 = vmatpush.msrb.mxu0 %v243_v42  ;;  %705 = vmatpush.msrb.mxu1 %v371_v43 }
  0xa7   : > { %728 = vmatpush.msrb.mxu2 %v220_v44  ;;  %748 = vmatpush.msrb.mxu3 %v348_v45 }
  0xa8   : > { %653 = vmatmul.f32.vlgmr.msra.gmra.mxu2 %v1194_v58  ;;  %673 = vmatmul.f32.vlgmr.msra.gmra.mxu3 %v1197_v59 }
  0xa9   : > { %686 = vmatpush.msrb.mxu0 %v235_v46  ;;  %706 = vmatpush.msrb.mxu1 %v363_v47 }
  0xaa   : > { %729 = vmatpush.msrb.mxu2 %v212_v48  ;;  %749 = vmatpush.msrb.mxu3 %v340_v49 }
  0xab   : > { %687 = vmatpush.msrb.mxu0 %v227_v50  ;;  %707 = vmatpush.msrb.mxu1 %v355_v51 }
  0xac   : > { %730 = vmatpush.msrb.mxu2 %v204_v52  ;;  %750 = vmatpush.msrb.mxu3 %v332_v53 }
  0xad   : > { %688 = vmatpush.msrb.mxu0 %v219_v54  ;;  %708 = vmatpush.msrb.mxu1 %v347_v55 }
  0xae   : > { %731 = vmatpush.msrb.mxu2 %v196_v56  ;;  %751 = vmatpush.msrb.mxu3 %v324_v57 }
  0xaf   : > { %613 = vmatmul.f32.vlgmr.msra.gmra.mxu0 %v1194_v58  ;;  %633 = vmatmul.f32.vlgmr.msra.gmra.mxu1 %v1197_v59 }
  0xb0   : > { %689 = vmatpush.msrb.mxu0 %v211_v60  ;;  %709 = vmatpush.msrb.mxu1 %v339_v61 }
  0xb1   : > { %732 = vmatpush.msrb.mxu2 %v188_v62  ;;  %752 = vmatpush.msrb.mxu3 %v316_v63 }
  0xb2   : > { %733 = vmatmul.f32.vlgmr.msrb.gmra.mxu2 %v1194_v58  ;;  %753 = vmatmul.f32.vlgmr.msrb.gmra.mxu3 %v1197_v59 }
  0xb3   : > { %690 = vmatpush.msrb.mxu0 %v203_v0  ;;  %710 = vmatpush.msrb.mxu1 %v331_v1 }
  0xb5   : > { %691 = vmatpush.msrb.mxu0 %v195_v2  ;;  %711 = vmatpush.msrb.mxu1 %v323_v3 }
  0xb7   : > { %692 = vmatpush.msrb.mxu0 %v187_v4  ;;  %712 = vmatpush.msrb.mxu1 %v315_v5 }
  0xb8   : > { %693 = vmatmul.f32.vlgmr.msrb.gmra.mxu0 %v1194_v58  ;;  %713 = vmatmul.f32.vlgmr.msrb.gmra.mxu1 %v1197_v59 }
  0xec   : > { %v514_v7 = vpop.f32.mrf.mxu3 }
  0xed   : > { %v494_v6 = vpop.f32.mrf.mxu2 }
  0xee   : > { %v454_v8 = vpop.f32.mrf.mxu0  ;;  %v515_v10 = vadd.f32 %v514_v7, %v494_v6 }
  0xef   : > { %v474_v9 = vpop.f32.mrf.mxu1 }
  0xf0   : > { %v475_v11 = vadd.f32 %v474_v9, %v454_v8  ;;  %758 = vst [vmem:[%s1216_s27 + $0x8] sm:$0xff] %v515_v10 }
  0xf2   : > { %757 = vst [vmem:[%s1216_s27] sm:$0xff] %v475_v11 }
 0x110   : > { %v594_v59 = vpop.f32.mrf.mxu3 }
 0x111   : > { %v574_v58 = vpop.f32.mrf.mxu2 }
 0x112   : > { %v534_v12 = vpop.f32.mrf.mxu0  ;;  %v554_v13 = vpop.f32.mrf.mxu1  ;;  %v595_v14 = vadd.f32 %v594_v59, %v574_v58 }
 0x113   : > { %v555_v15 = vadd.f32 %v554_v13, %v534_v12 }
 0x114   : > { %760 = vst [vmem:[%s1216_s27 + $0x18] sm:$0xff] %v595_v14 }
 0x115   : > { %759 = vst [vmem:[%s1216_s27 + $0x10] sm:$0xff] %v555_v15 }
 0x12b   : > { %v654_v16 = vpop.f32.mrf.mxu2  ;;  %v674_v17 = vpop.f32.mrf.mxu3 }
 0x12c   : > { %v614_v18 = vpop.f32.mrf.mxu0  ;;  %v634_v19 = vpop.f32.mrf.mxu1  ;;  %v675_v20 = vadd.f32 %v674_v17, %v654_v16 }
 0x12d   : > { %v635_v21 = vadd.f32 %v634_v19, %v614_v18 }
 0x12e   : > { %762 = vst [vmem:[%s1216_s27 + $0x28] sm:$0xff] %v675_v20 }
 0x12f   : > { %761 = vst [vmem:[%s1216_s27 + $0x20] sm:$0xff] %v635_v21 }
 0x135   : > { %v694_v22 = vpop.f32.mrf.mxu0  ;;  %v714_v23 = vpop.f32.mrf.mxu1 }
 0x136   : > { %v715_v24 = vadd.f32 %v714_v23, %v694_v22  ;;  %v734_v25 = vpop.f32.mrf.mxu2  ;;  %v754_v26 = vpop.f32.mrf.mxu3 }
 0x137   : > { %v755_v27 = vadd.f32 %v754_v26, %v734_v25 }
 0x138   : > { %763 = vst [vmem:[%s1216_s27 + $0x30] sm:$0xff] %v715_v24 }
 0x139   : > { %764 = vst [vmem:[%s1216_s27 + $0x38] sm:$0xff] %v755_v27 }
 0x13a   : > { %1026 = shalt.err (!%p1023_p8)
}
 0x13b   : > { %886 = dma.vmem_to_hbm [thread:$0]  (%p1148_p12), %s780_s15, 1024, %s782_s18, %s766_s19  }
 0x13c PF: > { %p903_p9 = scmp.ge.s32.totalorder %s1069_s12, 2  ;;  %s793_s29 = sand.u32 1, %s1057_s9  }
 0x13d   : > { %s794_s4 = scalar_lea.sflag [#allocation4], %s793_s29 }
 0x13e   : > { %p897_p10 = pnand %p903_p9, %p1153_p2 }
 0x140   : > { %p898_p13 = pneg %p897_p10 }
 0x142   : > { %1052 = dma.done.wait (%p898_p13), %s794_s4, 1024  }
 0x143   : > { %1054 = vsyncadd (%p898_p13), %s794_s4, 4294966272  ;;  %p16_p0 = scmp.ge.s32.totalorder %s1128_s23, 5   ;;  %s1267_s9 = smov %s1061_s10 }
 0x144   : > { %s1268_s10 = smov %s1065_s11  ;;  %s1269_s11 = smov %s1140_s26 }
 0x145   : > { %s1270_s12 = smov %s1128_s23  ;;  %18 = sbr.rel (!%p16_p0) target bundleno = 6 (0x6), region = 77 }
 0x14a   :  { %800 = vsyncpa [#allocation3], 1 }
 0x14b   :  { %802 = vsyncpa [#allocation3 + $0x1], 1 }
 0x14c   :  { %803 = vsyncpa [#allocation6], 1 }
 0x14d   :  { %804 = vsyncpa [#allocation4], 1 }
 0x14e   :  { %806 = vsyncpa [#allocation4 + $0x1], 1 }

</bundles_post_ra>
